<compile_context>
chip_gen: v6e
topology: v6e:2x2x1
jax: 0.10.0
libtpu: 0.0.40
codegen_flags: <defaults>
</compile_context>

<pallas_src>
import jax
import jax.numpy as jnp
from jax.experimental import pallas as pl
from jax.experimental.pallas import tpu as pltpu  # noqa: F401 (TPU backend assumed)

# ------------------------- problem configuration ---------------------------
NUM_LAYERS = 2            # number of "middle" 5->5 Linear layers
X_SHAPE = (2, 4, 16)      # example input; input_size = prod(X_SHAPE) = 128
INPUT_SIZE = 2 * 4 * 16   # 128
HID = 5                   # hidden width of the MLP
OUT = 2                   # output width

# TPU-padded sizes (lane dim multiple of 128)
D_IN = ((INPUT_SIZE + 127) // 128) * 128   # 128
D_OUT = 128                                # one MXU-native column block


# ------------------------------ Pallas kernel -------------------------------
def _fused_affine_kernel(x_ref, w_ref, b_ref, o_ref):
    # x_ref: (1, D_IN)      f32  row 0 = flattened input
    # w_ref: (D_IN, D_OUT)  f32  fused + column-padded weight  W1^T Wm1^T ... Wo^T
    # b_ref: (1, OUT)       f32  fused bias (only the real OUT columns)
    # o_ref: (1, OUT)       f32  only the real outputs are stored (masked vst)
    y = jnp.dot(x_ref[...], w_ref[...], preferred_element_type=jnp.float32)
    o_ref[...] = y[:, :OUT] + b_ref[...]


# ------------------------ one-time parameter prep ---------------------------
def fuse_and_pad_params(params, num_layers=NUM_LAYERS):
    """Init-time algebraic fusion + TPU padding (hoisted out of per-call path).

    test_net has NO nonlinearity between its Linear layers, so the chain
    collapses exactly to a single affine map:
        y = x @ (W1^T Wm1^T ... WmN^T Wo^T) + b_fused
    The tiny 5x5 / 5x2 products run once in plain JAX f32.  The fused weight
    is kept in f32 (64 KiB, trivially VMEM-resident) and only the real OUT
    bias columns are carried.
    """
    w1, b1, wm, bm, wo, bo = params
    W = w1.T.astype(jnp.float32)            # (input_size, HID)
    b = b1.astype(jnp.float32)              # (HID,)
    for i in range(num_layers):
        W = W @ wm[i].T
        b = b @ wm[i].T + bm[i]
    W = W @ wo.T                            # (input_size, OUT)
    b = b @ wo.T + bo                       # (OUT,)

    w_pad = jnp.zeros((D_IN, D_OUT), jnp.float32)
    w_pad = w_pad.at[: W.shape[0], : W.shape[1]].set(W)
    b_out = b.reshape(1, OUT).astype(jnp.float32)
    return w_pad, b_out


# ------------------------------- forward ------------------------------------
@jax.jit
def test_net_forward(x, w_pad, b_out):
    """JAX/Pallas equivalent of test_net.forward (returns shape (OUT,))."""
    if INPUT_SIZE == D_IN:
        # Pure reshape, no extra XLA fusion kernel before the custom call.
        x_row = x.reshape(1, D_IN).astype(jnp.float32)
    else:
        # Static fallback for input sizes that are not a multiple of 128.
        xf = x.reshape(-1).astype(jnp.float32)
        x_row = jnp.zeros((1, D_IN), jnp.float32).at[0, : xf.shape[0]].set(xf)

    out = pl.pallas_call(
        _fused_affine_kernel,
        out_shape=jax.ShapeDtypeStruct((1, OUT), jnp.float32),
        in_specs=[
            pl.BlockSpec((1, D_IN), lambda: (0, 0)),
            pl.BlockSpec((D_IN, D_OUT), lambda: (0, 0)),
            pl.BlockSpec((1, OUT), lambda: (0, 0)),
        ],
        out_specs=pl.BlockSpec((1, OUT), lambda: (0, 0)),
    )(x_row, w_pad, b_out)

    return out[0]                            # (OUT,) — free bitcast reshape


# ------------------------- deterministic parameters -------------------------
def init_params(key, num_layers=NUM_LAYERS, input_size=INPUT_SIZE):
    """Deterministic init mimicking nn.Linear default U(-1/sqrt(fan_in), +)."""
    keys = jax.random.split(key, 2 + 2 * num_layers + 2)

    def lin(kw, kb, fan_in, fan_out):
        bound = 1.0 / jnp.sqrt(jnp.float32(fan_in))
        w = jax.random.uniform(kw, (fan_out, fan_in), jnp.float32, -bound, bound)
        b = jax.random.uniform(kb, (fan_out,), jnp.float32, -bound, bound)
        return w, b

    w1, b1 = lin(keys[0], keys[1], input_size, HID)
    wm, bm = [], []
    for i in range(num_layers):
        w, b = lin(keys[2 + 2 * i], keys[3 + 2 * i], HID, HID)
        wm.append(w)
        bm.append(b)
    wo, bo = lin(keys[-2], keys[-1], HID, OUT)
    return w1, b1, jnp.stack(wm), jnp.stack(bm), wo, bo


if __name__ == "__main__":
    key = jax.random.PRNGKey(0)
    k_x, k_p = jax.random.split(key)
    x = jax.random.normal(k_x, X_SHAPE, jnp.float32)
    params = init_params(k_p)

    # one-time fusion/padding (NOT in the per-call path)
    w_pad, b_out = fuse_and_pad_params(params)
    w_pad, b_out = jax.block_until_ready((w_pad, b_out))

    out = test_net_forward(x, w_pad, b_out)
    jax.block_until_ready(out)

    # reference: layer-by-layer f32 chain, exactly mirroring the PyTorch module
    w1, b1, wm, bm, wo, bo = params
    h = x.reshape(-1) @ w1.T + b1
    for i in range(NUM_LAYERS):
        h = h @ wm[i].T + bm[i]
    ref = h @ wo.T + bo

    assert out.shape == (OUT,)
    # everything is f32 now (fusion only reorders tiny matmuls) => tight tol
    assert jnp.allclose(out, ref, atol=1e-4, rtol=1e-4), (out, ref)
    print("KERNEL_OK")
</pallas_src>

<mosaic_0001>
module attributes {stable_mosaic.version = 11 : i64} {
  func.func @_fused_affine_kernel(%arg0: memref<1x128xf32, #tpu.memory_space<vmem>>, %arg1: memref<128x128xf32, #tpu.memory_space<vmem>>, %arg2: memref<1x2xf32, #tpu.memory_space<vmem>>, %arg3: memref<1x2xf32, #tpu.memory_space<vmem>>) attributes {dimension_semantics = [], scalar_prefetch = 0 : i64, scratch_operands = 0 : i64, tpu.core_type = #tpu.core_type<tc>} {
    %c0 = arith.constant 0 : index
    %c0_0 = arith.constant 0 : index
    %0 = vector.load %arg0[%c0, %c0_0] : memref<1x128xf32, #tpu.memory_space<vmem>>, vector<1x128xf32>
    %c0_1 = arith.constant 0 : index
    %c0_2 = arith.constant 0 : index
    %1 = vector.load %arg1[%c0_1, %c0_2] : memref<128x128xf32, #tpu.memory_space<vmem>>, vector<128x128xf32>
    %cst = arith.constant dense<0.000000e+00> : vector<1x128xf32>
    %2 = tpu.matmul %0, %1, %cst {dimension_numbers = #tpu.dot_dimension_numbers<[1], [0], [0], [1], [0, 0, 1, 1], [], []>} : vector<1x128xf32>, vector<128x128xf32>, vector<1x128xf32> -> vector<1x128xf32>
    %3 = vector.extract_strided_slice %2 {offsets = [0, 0], sizes = [1, 2], strides = [1, 1]} : vector<1x128xf32> to vector<1x2xf32>
    %c0_3 = arith.constant 0 : index
    %c0_4 = arith.constant 0 : index
    %4 = vector.load %arg2[%c0_3, %c0_4] : memref<1x2xf32, #tpu.memory_space<vmem>>, vector<1x2xf32>
    %5 = arith.addf %3, %4 : vector<1x2xf32>
    %c0_5 = arith.constant 0 : index
    %c0_6 = arith.constant 0 : index
    %6 = vector.load %arg3[%c0_5, %c0_6] : memref<1x2xf32, #tpu.memory_space<vmem>>, vector<1x2xf32>
    tpu.vector_store %arg3[%c0_5, %c0_6], %5 {strides = array<i32>} : memref<1x2xf32, #tpu.memory_space<vmem>>, vector<1x2xf32>,
    return
  }
}

</mosaic_0001>

<bundles_post_ra>
// kernel: test_net_forward.1
= control target key start
LH: loop header
LB: loop body
LE: loop exit
PB: predicated region body
PF: predicated region fallthrough
CT: control target
= control target key end

     0   :  { %8 = vsyncpa [#allocation3], 0  ;;  %s275_s0 = inlined_call_operand.vmem [shape: f32[1,128], index: 0, kind: input, shape index: {}]   ;;  %s276_s1 = inlined_call_operand.hbm [shape: f32[128,128], index: 1, kind: input, shape index: {}]   ;;  %s277_s2 = inlined_call_operand.vmem [shape: f32[1,2], index: 2, kind: input, shape index: {}]   ;;  %s278_s3 = inlined_call_operand.hbm [shape: f32[1,2], index: 3, kind: output, shape index: {}]  }
   0x1   :  { %9 = vsyncpa [#allocation4], 0  ;;  %s237_s12 = smov [#allocation2]  }
   0x2   :  { %s17_s13 = sshll.u32 %s237_s12, 4  ;;  %s18_s13 = int_to_ptr.vmem [resolvable:$true] %s17_s13 }
   0x3   :  { %s201_s14 = scalar_lea.vmem %s18_s13, 2048  ;;  %p206_p1 = scmp.lt.s32.totalorder %s18_s13, %s18_s13 }
   0x4   :  { %p202_p0 = scmp.ne.s32.totalorder %s18_s13, %s201_s14  ;;  %p207_p2 = scmp.lt.s32.totalorder %s201_s14, %s201_s14 }
   0x6   :  { %p208_p3 = por %p207_p2, %p206_p1 }
   0x8   :  { %p209_p4 = pnand %p208_p3, %p202_p0 }
   0xa   :  { %212 = shalt.err (!%p209_p4)
}
   0xb   :  { %s238_s15 = smov 128   ;;  %s239_s16 = smov 8  }
   0xc   :  { %23 = dma.hbm_to_vmem [thread:$0]  %s276_s1, 2048, %s18_s13, [#allocation3], %s238_s15, %s238_s15, %s239_s16  }
   0xd   :  { %233 = dma.done.wait [#allocation3], 2048  }
   0xe   :  { %234 = vsyncadd [#allocation3], 4294965248  ;;  %v240_v0 = vmov 0.0   ;;  %vm241_vm0 = vmmov 0   ;;  %v45_v1 = vld [vmem:[#allocation2 + $0x78] sm:$0xff]  ;;  %v44_v2 = vld [vmem:[#allocation2 + $0x70] sm:$0xff] }
   0xf   :  { %152 = vmatprep.subr.mxu0 %v240_v0  ;;  %184 = vmatprep.mubr.msk.f32.mxu0 %vm241_vm0, %v240_v0  ;;  %v43_v3 = vld [vmem:[#allocation2 + $0x68] sm:$0xff]  ;;  %v42_v4 = vld [vmem:[#allocation2 + $0x60] sm:$0xff]  ;;  %v41_v5 = vld [vmem:[#allocation2 + $0x58] sm:$0xff]  ;;  %s242_s22 = smov [#allocation5]   ;;  %vm118_vm1 = vcmask 8192  }
  0x10   :  { %153 = vmatpush3.msra.mxu0 %v45_v1  ;;  %v40_v6 = vld [vmem:[#allocation2 + $0x50] sm:$0xff]  ;;  %v39_v7 = vld [vmem:[#allocation2 + $0x48] sm:$0xff]  ;;  %v38_v8 = vld [vmem:[#allocation2 + $0x40] sm:$0xff]  ;;  %s126_s23 = sshll.u32 %s242_s22, 4  ;;  %s127_s23 = int_to_ptr.vmem [resolvable:$true] %s126_s23 }
  0x11   :  { %154 = vmatprep.subr.mxu0 %v240_v0  ;;  %v37_v9 = vld [vmem:[#allocation2 + $0x38] sm:$0xff]  ;;  %v36_v10 = vld [vmem:[#allocation2 + $0x30] sm:$0xff]  ;;  %v35_v11 = vld [vmem:[#allocation2 + $0x28] sm:$0xff]  ;;  %s213_s24 = scalar_lea.vmem %s127_s23, 16  ;;  %s217_s25 = scalar_lea.vmem %s127_s23, 32 }
  0x12   :  { %155 = vmatpush3.msra.mxu0 %v44_v2  ;;  %v34_v12 = vld [vmem:[#allocation2 + $0x20] sm:$0xff]  ;;  %v33_v13 = vld [vmem:[#allocation2 + $0x18] sm:$0xff]  ;;  %v32_v14 = vld [vmem:[#allocation2 + $0x10] sm:$0xff]  ;;  %p214_p5 = scmp.ne.s32.totalorder %s127_s23, %s213_s24  ;;  %p218_p6 = scmp.lt.s32.totalorder %s127_s23, %s127_s23 }
  0x13   :  { %156 = vmatprep.subr.mxu0 %v240_v0  ;;  %v31_v15 = vld [vmem:[#allocation2 + $0x8] sm:$0xff]  ;;  %v30_v16 = vld [vmem:[#allocation2] sm:$0xff]  ;;  %p219_p7 = scmp.lt.s32.totalorder %s217_s25, %s213_s24 }
  0x14   :  { %157 = vmatpush3.msra.mxu0 %v43_v3  ;;  %v29_v17 = vld [vmem:[%s275_s0] sm:$0x1] }
  0x15   :  { %158 = vmatprep.subr.mxu0 %v240_v0  ;;  %v116_v18 = vld [vmem:[%s277_s2] sm:$0x1]  ;;  %p220_p8 = por %p219_p7, %p218_p6 }
  0x16   :  { %159 = vmatpush3.msra.mxu0 %v42_v4 }
  0x17   :  { %160 = vmatprep.subr.mxu0 %v240_v0  ;;  %p221_p9 = pnand %p220_p8, %p214_p5 }
  0x18   :  { %161 = vmatpush3.msra.mxu0 %v41_v5 }
  0x19   :  { %162 = vmatprep.subr.mxu0 %v240_v0 }
  0x1a   :  { %163 = vmatpush3.msra.mxu0 %v40_v6 }
  0x1b   :  { %164 = vmatprep.subr.mxu0 %v240_v0 }
  0x1c   :  { %165 = vmatpush3.msra.mxu0 %v39_v7 }
  0x1d   :  { %166 = vmatprep.subr.mxu0 %v240_v0 }
  0x1e   :  { %167 = vmatpush3.msra.mxu0 %v38_v8 }
  0x1f   :  { %168 = vmatprep.subr.mxu0 %v240_v0 }
  0x20   :  { %169 = vmatpush3.msra.mxu0 %v37_v9 }
  0x21   :  { %170 = vmatprep.subr.mxu0 %v240_v0 }
  0x22   :  { %171 = vmatpush3.msra.mxu0 %v36_v10 }
  0x23   :  { %172 = vmatprep.subr.mxu0 %v240_v0 }
  0x24   :  { %173 = vmatpush3.msra.mxu0 %v35_v11 }
  0x25   :  { %174 = vmatprep.subr.mxu0 %v240_v0 }
  0x26   :  { %175 = vmatpush3.msra.mxu0 %v34_v12 }
  0x27   :  { %176 = vmatprep.subr.mxu0 %v240_v0 }
  0x28   :  { %177 = vmatpush3.msra.mxu0 %v33_v13 }
  0x29   :  { %178 = vmatprep.subr.mxu0 %v240_v0 }
  0x2a   :  { %179 = vmatpush3.msra.mxu0 %v32_v14 }
  0x2b   :  { %180 = vmatprep.subr.mxu0 %v240_v0 }
  0x2c   :  { %181 = vmatpush3.msra.mxu0 %v31_v15 }
  0x2d   :  { %182 = vmatprep.subr.mxu0 %v240_v0 }
  0x2e   :  { %183 = vmatpush3.msra.mxu0 %v30_v16 }
  0x2f   :  { %185 = vmatmul.mubr.f32.vlgmr.msra.gmra.mxu0 %v29_v17 }
  0xef   :  { %v112_v19 = vpop.f32.mrf.mxu0 }
  0xf0   :  { %v117_v20 = vadd.f32 %v116_v18, %v112_v19 }
  0xf1   :  { %v186_v21 = vpop.f32.mrf.mxu0 }
  0xf2   :  { %119 = vst.msk [vmem:[#allocation5] sm:$0x1] %vm118_vm1, %v117_v20 }
  0xf3   :  { %224 = shalt.err (!%p221_p9)
}
  0xf4   :  { %129 = dma.vmem_to_hbm [thread:$0]  %s127_s23, 16, %s278_s3, [#allocation4]  }
  0xf5   :  { %235 = dma.done.wait [#allocation4], 16  }
  0xf6   :  { %236 = vsyncadd [#allocation4], 4294967280 }
  0xf7   :  { %133 = vsyncpa [#allocation3], 1 }
  0xf8   :  { %134 = vsyncpa [#allocation4], 1 }

</bundles_post_ra>
